<compile_context>
chip_gen: v6e
topology: v6e:2x2x1
jax: 0.10.0
libtpu: 0.0.40
codegen_flags: <defaults>
</compile_context>

<pallas_src>
import functools

import jax
import jax.numpy as jnp
from jax.experimental import pallas as pl
from jax.experimental.pallas import tpu as pltpu


def _round_up(x, m):
    return (x + m - 1) // m * m


def _vmem_budget():
    """(tile-sizing budget, vmem_limit_bytes) sized per TPU generation."""
    cap = 64 * 1024 * 1024                      # safe fallback (v7x: 64 MiB/TC)
    try:
        info = pltpu.get_tpu_info()
        cap = int(getattr(info, "vmem_capacity_bytes", cap)) or cap
    except Exception:
        pass
    budget = (cap * 3) // 4                     # ~96 MiB on 128 MiB parts, 48 MiB on v7x
    limit = min(cap, budget + (16 << 20))
    return budget, limit


def _conv_stats_kernel(patches_ref, w_ref, conv_ref, stats_ref):
    """Pass 1: conv matmul tile (bf16 MXU, f32 acc) + per-tile sum / sumsq."""
    conv = jnp.dot(patches_ref[...], w_ref[...],
                   preferred_element_type=jnp.float32)
    conv_ref[...] = conv.astype(conv_ref.dtype)           # bf16 intermediate
    s = jnp.sum(conv, axis=0, keepdims=True)               # f32 stats from MXU acc
    ss = jnp.sum(conv * conv, axis=0, keepdims=True)
    pad = jnp.zeros((6, s.shape[1]), jnp.float32)           # fill the (8, Coutp) block
    stats_ref[...] = jnp.concatenate([s, ss, pad], axis=0)


def _bn_act_kernel(conv_ref, scale_ref, shift_ref, o_ref, *, neg_slope):
    """Pass 2: folded BN (one FMA) + ReLU / LeakyReLU(0.2), in place (bf16)."""
    y = conv_ref[...].astype(jnp.float32) * scale_ref[...] + shift_ref[...]
    o_ref[...] = jnp.where(y > 0, y, neg_slope * y).astype(o_ref.dtype)


def block_forward(x, weight, gamma, beta, *, act="relu"):
    """Forward pass of Block(down=True, use_dropout=False).

    x:      (B, Cin, H, W)   NCHW float32
    weight: (Cout, Cin, 4, 4)
    gamma, beta: (Cout,)
    returns (B, Cout, H//2, W//2) NCHW float32
    """
    B, Cin, H, W = x.shape
    Cout = weight.shape[0]
    assert H % 2 == 0 and W % 2 == 0, "k=4,s=2,p=1 conv path assumes even H, W"
    Ho, Wo = H // 2, W // 2
    K = Cin * 16
    M = B * Ho * Wo

    Kp = _round_up(K, 128)
    Coutp = _round_up(Cout, 128)

    budget, vmem_limit = _vmem_budget()

    # --- pass-1 tile: resident (double-buffered) weights + bf16 tiles -------
    fixed = 2 * Kp * Coutp * 2 + 2 * 8 * Coutp * 4
    per_row = 2 * (Kp * 2 + Coutp * 2)          # 2-buffered bf16 patches + bf16 conv out
    tm = max(32, (budget - fixed) // per_row)
    TM1 = max(32, min(2048, (tm // 32) * 32, _round_up(M, 32)))

    # --- pass-2 tile: pure streaming, larger tile, multiple of TM1 ----------
    f = max(1, min(2048 // TM1, -(-M // TM1), budget // (8 * Coutp * TM1)))
    while f > 1 and _round_up(M, TM1 * f) > _round_up(M, TM1):
        f //= 2                                  # never pad M beyond pass-1's own padding
    TM2 = TM1 * f
    Mp = _round_up(M, TM2)                       # multiple of both TM1 and TM2
    n1, n2 = Mp // TM1, Mp // TM2

    # --- light im2col: NHWC once, per-(kh,kw) strided slices, channel concat.
    #     K is ordered (kh, kw, cin); the tiny weight tensor is permuted to match.
    x_nhwc = jnp.transpose(x, (0, 2, 3, 1))
    xp = jnp.pad(x_nhwc, ((0, 0), (1, 1), (1, 1), (0, 0)), mode="reflect")
    cols = [xp[:, kh:kh + 2 * Ho:2, kw:kw + 2 * Wo:2, :]
            for kh in range(4) for kw in range(4)]
    patches = jnp.concatenate(cols, axis=-1).reshape(M, K).astype(jnp.bfloat16)
    patches = jnp.pad(patches, ((0, Mp - M), (0, Kp - K)))

    w_mat = jnp.transpose(weight, (2, 3, 1, 0)).reshape(K, Cout)   # (kh,kw,cin) x Cout
    w_mat = jnp.pad(w_mat.astype(jnp.bfloat16), ((0, Kp - K), (0, Coutp - Cout)))

    neg_slope = 0.0 if act == "relu" else 0.2

    # ---- pass 1: conv matmul (bf16 out) + per-tile BN partial stats --------
    conv_full, stats = pl.pallas_call(
        _conv_stats_kernel,
        out_shape=(jax.ShapeDtypeStruct((Mp, Coutp), jnp.bfloat16),
                   jax.ShapeDtypeStruct((n1 * 8, Coutp), jnp.float32)),
        grid=(n1,),
        in_specs=[
            pl.BlockSpec((TM1, Kp), lambda i: (i, 0)),       # patches tile
            pl.BlockSpec((Kp, Coutp), lambda i: (0, 0)),     # weights (resident)
        ],
        out_specs=(
            pl.BlockSpec((TM1, Coutp), lambda i: (i, 0)),    # conv bf16 tile
            pl.BlockSpec((8, Coutp), lambda i: (i, 0)),      # per-tile sum/sumsq
        ),
        compiler_params=pltpu.CompilerParams(
            dimension_semantics=("parallel",),
            vmem_limit_bytes=vmem_limit),
    )(patches, w_mat)

    # ---- tiny BN-stat reduction + fold into scale/shift (done in XLA) ------
    gamma_p = jnp.pad(gamma.astype(jnp.float32), (0, Coutp - Cout),
                      constant_values=1.0)
    beta_p = jnp.pad(beta.astype(jnp.float32), (0, Coutp - Cout))
    stats = stats.reshape(n1, 8, Coutp)
    inv_m = jnp.float32(1.0 / M)                 # padded rows contribute exact zeros
    mean = jnp.sum(stats[:, 0, :], axis=0) * inv_m
    var = jnp.maximum(jnp.sum(stats[:, 1, :], axis=0) * inv_m - mean * mean, 0.0)
    scale = (gamma_p * jax.lax.rsqrt(var + 1e-5)).reshape(1, Coutp)
    shift = (beta_p - mean * scale[0]).reshape(1, Coutp)

    # ---- pass 2: y = conv*scale + shift, activation, in place (bf16) -------
    out_flat = pl.pallas_call(
        functools.partial(_bn_act_kernel, neg_slope=neg_slope),
        out_shape=jax.ShapeDtypeStruct((Mp, Coutp), jnp.bfloat16),
        grid=(n2,),
        in_specs=[
            pl.BlockSpec((TM2, Coutp), lambda i: (i, 0)),
            pl.BlockSpec((1, Coutp), lambda i: (0, 0)),
            pl.BlockSpec((1, Coutp), lambda i: (0, 0)),
        ],
        out_specs=pl.BlockSpec((TM2, Coutp), lambda i: (i, 0)),
        input_output_aliases={0: 0},             # bf16 in -> bf16 out, dtypes match
        compiler_params=pltpu.CompilerParams(
            dimension_semantics=("parallel",),
            vmem_limit_bytes=vmem_limit),
    )(conv_full, scale, shift)

    # NOTE: in a full UvU-Net this would stay NHWC/bf16 and only be de-padded /
    # transposed once at the network boundary; done here to match PyTorch NCHW.
    out = out_flat[:M, :Cout].astype(jnp.float32).reshape(B, Ho, Wo, Cout)
    return jnp.transpose(out, (0, 3, 1, 2))


def _ref_forward(x, weight, gamma, beta, act="relu"):
    """Pure-JAX f32 reference of the PyTorch Block forward (training-mode BN)."""
    xp = jnp.pad(x, ((0, 0), (0, 0), (1, 1), (1, 1)), mode="reflect")
    conv = jax.lax.conv_general_dilated(
        xp, weight, window_strides=(2, 2), padding="VALID",
        dimension_numbers=("NCHW", "OIHW", "NCHW"))
    mean = conv.mean(axis=(0, 2, 3), keepdims=True)
    var = ((conv - mean) ** 2).mean(axis=(0, 2, 3), keepdims=True)
    y = (conv - mean) * jax.lax.rsqrt(var + 1e-5)
    y = y * gamma.reshape(1, -1, 1, 1) + beta.reshape(1, -1, 1, 1)
    ns = 0.0 if act == "relu" else 0.2
    return jnp.where(y > 0, y, ns * y)


if __name__ == "__main__":
    key = jax.random.PRNGKey(0)
    B, Cin, Cout, H, W = 2, 4, 8, 16, 16

    k_x, k_w, k_g, k_b = jax.random.split(key, 4)
    x = jax.random.normal(k_x, (B, Cin, H, W), dtype=jnp.float32)
    weight = 0.1 * jax.random.normal(k_w, (Cout, Cin, 4, 4), dtype=jnp.float32)
    gamma = 1.0 + 0.1 * jax.random.normal(k_g, (Cout,), dtype=jnp.float32)
    beta = 0.1 * jax.random.normal(k_b, (Cout,), dtype=jnp.float32)

    fwd = jax.jit(functools.partial(block_forward, act="relu"))
    out = fwd(x, weight, gamma, beta)
    jax.block_until_ready(out)
    assert out.shape == (B, Cout, H // 2, W // 2)

    ref = _ref_forward(x, weight, gamma, beta, act="relu")
    err = float(jnp.max(jnp.abs(out - ref)))
    # bf16 MXU operands + bf16 conv/activation intermediates -> loose tolerance.
    assert err < 0.1, f"max abs error {err}"

    print("KERNEL_OK")
</pallas_src>

<mosaic_0001>
module attributes {stable_mosaic.version = 11 : i64} {
  func.func @_bn_act_kernel(%arg0: i32, %arg1: memref<128x128xbf16, #tpu.memory_space<vmem>>, %arg2: memref<1x128xf32, #tpu.memory_space<vmem>>, %arg3: memref<1x128xf32, #tpu.memory_space<vmem>>, %arg4: memref<128x128xbf16, #tpu.memory_space<vmem>>) attributes {dimension_semantics = [#tpu.dimension_semantics<parallel>], iteration_bounds = array<i64: 1>, scalar_prefetch = 0 : i64, scratch_operands = 0 : i64, tpu.core_type = #tpu.core_type<tc>, window_params = [{transform_indices = @transform_0, window_bounds = array<i64: 128, 128>}, {pipeline_mode = #tpu.pipeline_mode<synchronous>, transform_indices = @transform_1, window_bounds = array<i64: 1, 128>}, {pipeline_mode = #tpu.pipeline_mode<synchronous>, transform_indices = @transform_2, window_bounds = array<i64: 1, 128>}, {transform_indices = @transform_3, window_bounds = array<i64: 128, 128>}]} {
    %c0 = arith.constant 0 : index
    %c0_0 = arith.constant 0 : index
    %0 = vector.load %arg1[%c0, %c0_0] : memref<128x128xbf16, #tpu.memory_space<vmem>>, vector<128x128xbf16>
    %1 = arith.extf %0 : vector<128x128xbf16> to vector<128x128xf32>
    %c0_1 = arith.constant 0 : index
    %c0_2 = arith.constant 0 : index
    %2 = vector.load %arg2[%c0_1, %c0_2] : memref<1x128xf32, #tpu.memory_space<vmem>>, vector<1x128xf32>
    %3 = vector.broadcast %2 : vector<1x128xf32> to vector<128x128xf32>
    %4 = arith.mulf %1, %3 : vector<128x128xf32>
    %c0_3 = arith.constant 0 : index
    %c0_4 = arith.constant 0 : index
    %5 = vector.load %arg3[%c0_3, %c0_4] : memref<1x128xf32, #tpu.memory_space<vmem>>, vector<1x128xf32>
    %6 = vector.broadcast %5 : vector<1x128xf32> to vector<128x128xf32>
    %7 = arith.addf %4, %6 : vector<128x128xf32>
    %cst = arith.constant 0.000000e+00 : f32
    %8 = vector.broadcast %cst : f32 to vector<128x128xf32>
    %9 = arith.cmpf ogt, %7, %8 : vector<128x128xf32>
    %cst_5 = arith.constant 0.000000e+00 : f32
    %10 = vector.broadcast %cst_5 : f32 to vector<128x128xf32>
    %11 = arith.mulf %10, %7 : vector<128x128xf32>
    %12 = arith.select %9, %7, %11 : vector<128x128xi1>, vector<128x128xf32>
    %13 = arith.truncf %12 : vector<128x128xf32> to vector<128x128xbf16>
    %c0_6 = arith.constant 0 : index
    %c0_7 = arith.constant 0 : index
    %14 = vector.load %arg4[%c0_6, %c0_7] : memref<128x128xbf16, #tpu.memory_space<vmem>>, vector<128x128xbf16>
    tpu.vector_store %arg4[%c0_6, %c0_7], %13 {strides = array<i32>} : memref<128x128xbf16, #tpu.memory_space<vmem>>, vector<128x128xbf16>,
    return
  }
  func.func @transform_0(%arg0: i32) -> (i32, i32) {
    %c0_i32 = arith.constant 0 : i32
    %c0_i32_0 = arith.constant 0 : i32
    return %arg0, %c0_i32 : i32, i32
  }
  func.func @transform_1(%arg0: i32) -> (i32, i32) {
    %c0_i32 = arith.constant 0 : i32
    %c0_i32_0 = arith.constant 0 : i32
    %c0_i32_1 = arith.constant 0 : i32
    return %c0_i32, %c0_i32_0 : i32, i32
  }
  func.func @transform_2(%arg0: i32) -> (i32, i32) {
    %c0_i32 = arith.constant 0 : i32
    %c0_i32_0 = arith.constant 0 : i32
    %c0_i32_1 = arith.constant 0 : i32
    return %c0_i32, %c0_i32_0 : i32, i32
  }
  func.func @transform_3(%arg0: i32) -> (i32, i32) {
    %c0_i32 = arith.constant 0 : i32
    %c0_i32_0 = arith.constant 0 : i32
    return %arg0, %c0_i32 : i32, i32
  }
}

module attributes {stable_mosaic.version = 11 : i64} {
  func.func @_conv_stats_kernel(%arg0: i32, %arg1: memref<128x128xbf16, #tpu.memory_space<vmem>>, %arg2: memref<128x128xbf16, #tpu.memory_space<vmem>>, %arg3: memref<128x128xbf16, #tpu.memory_space<vmem>>, %arg4: memref<8x128xf32, #tpu.memory_space<vmem>>) attributes {dimension_semantics = [#tpu.dimension_semantics<parallel>], iteration_bounds = array<i64: 1>, scalar_prefetch = 0 : i64, scratch_operands = 0 : i64, tpu.core_type = #tpu.core_type<tc>, window_params = [{transform_indices = @transform_0, window_bounds = array<i64: 128, 128>}, {pipeline_mode = #tpu.pipeline_mode<synchronous>, transform_indices = @transform_1, window_bounds = array<i64: 128, 128>}, {transform_indices = @transform_2, window_bounds = array<i64: 128, 128>}, {transform_indices = @transform_3, window_bounds = array<i64: 8, 128>}]} {
    %c0 = arith.constant 0 : index
    %c0_0 = arith.constant 0 : index
    %0 = vector.load %arg1[%c0, %c0_0] : memref<128x128xbf16, #tpu.memory_space<vmem>>, vector<128x128xbf16>
    %c0_1 = arith.constant 0 : index
    %c0_2 = arith.constant 0 : index
    %1 = vector.load %arg2[%c0_1, %c0_2] : memref<128x128xbf16, #tpu.memory_space<vmem>>, vector<128x128xbf16>
    %cst = arith.constant dense<0.000000e+00> : vector<128x128xf32>
    %2 = tpu.matmul %0, %1, %cst {dimension_numbers = #tpu.dot_dimension_numbers<[1], [0], [0], [1], [0, 0, 1, 1], [], []>} : vector<128x128xbf16>, vector<128x128xbf16>, vector<128x128xf32> -> vector<128x128xf32>
    %3 = arith.truncf %2 : vector<128x128xf32> to vector<128x128xbf16>
    %c0_3 = arith.constant 0 : index
    %c0_4 = arith.constant 0 : index
    %4 = vector.load %arg3[%c0_3, %c0_4] : memref<128x128xbf16, #tpu.memory_space<vmem>>, vector<128x128xbf16>
    tpu.vector_store %arg3[%c0_3, %c0_4], %3 {strides = array<i32>} : memref<128x128xbf16, #tpu.memory_space<vmem>>, vector<128x128xbf16>,
    %cst_5 = arith.constant dense<0.000000e+00> : vector<128xf32>
    %5 = vector.multi_reduction <add>, %2, %cst_5 [0] : vector<128x128xf32> to vector<128xf32>
    %6 = vector.shape_cast %5 : vector<128xf32> to vector<1x128xf32>
    %7 = arith.mulf %2, %2 : vector<128x128xf32>
    %cst_6 = arith.constant dense<0.000000e+00> : vector<128xf32>
    %8 = vector.multi_reduction <add>, %7, %cst_6 [0] : vector<128x128xf32> to vector<128xf32>
    %9 = vector.shape_cast %8 : vector<128xf32> to vector<1x128xf32>
    %cst_7 = arith.constant 0.000000e+00 : f32
    %10 = vector.broadcast %cst_7 : f32 to vector<6x128xf32>
    %11 = tpu.concatenate %6, %9, %10 in 0 : vector<1x128xf32>, vector<1x128xf32>, vector<6x128xf32> -> vector<8x128xf32>
    %c0_8 = arith.constant 0 : index
    %c0_9 = arith.constant 0 : index
    %12 = vector.load %arg4[%c0_8, %c0_9] : memref<8x128xf32, #tpu.memory_space<vmem>>, vector<8x128xf32>
    tpu.vector_store %arg4[%c0_8, %c0_9], %11 {strides = array<i32>} : memref<8x128xf32, #tpu.memory_space<vmem>>, vector<8x128xf32>,
    return
  }
  func.func @transform_0(%arg0: i32) -> (i32, i32) {
    %c0_i32 = arith.constant 0 : i32
    %c0_i32_0 = arith.constant 0 : i32
    return %arg0, %c0_i32 : i32, i32
  }
  func.func @transform_1(%arg0: i32) -> (i32, i32) {
    %c0_i32 = arith.constant 0 : i32
    %c0_i32_0 = arith.constant 0 : i32
    %c0_i32_1 = arith.constant 0 : i32
    return %c0_i32, %c0_i32_0 : i32, i32
  }
  func.func @transform_2(%arg0: i32) -> (i32, i32) {
    %c0_i32 = arith.constant 0 : i32
    %c0_i32_0 = arith.constant 0 : i32
    return %arg0, %c0_i32 : i32, i32
  }
  func.func @transform_3(%arg0: i32) -> (i32, i32) {
    %c0_i32 = arith.constant 0 : i32
    %c0_i32_0 = arith.constant 0 : i32
    return %arg0, %c0_i32 : i32, i32
  }
}

</mosaic_0001>

<bundles_post_ra>
// kernel: block_forward.3
= control target key start
LH: loop header
LB: loop body
LE: loop exit
PB: predicated region body
PF: predicated region fallthrough
CT: control target
= control target key end

     0   :  { %s455_s0 = inlined_call_operand.vmem [shape: bf16[128,128], index: 0, kind: input, shape index: {}, may-alias: {0,3}]   ;;  %s456_s1 = inlined_call_operand.vmem [shape: f32[1,128], index: 1, kind: input, shape index: {}]   ;;  %s457_s2 = inlined_call_operand.vmem [shape: f32[1,128], index: 2, kind: input, shape index: {}]   ;;  %s458_s3 = inlined_call_operand.vmem [shape: bf16[128,128], index: 3, kind: output, shape index: {}, may-alias: {0,3}]  }
   0x1   :  { %v259_v0 = vld [vmem:[%s455_s0] sm:$0xff]   ;;  %v330_v4 = vld [vmem:[%s455_s0 + $0x8] sm:$0xff]   ;;  %v331_v5 = vld [vmem:[%s455_s0 + $0x10] sm:$0xff]  }
   0x2   :  { %v370_v1 = vld [vmem:[%s456_s1] ss:$0 sm:$0xff]  ;;  %v260_v2 = vunpack.c.l.bf16 %v259_v0  ;;  %v261_v3 = vunpack.c.h.bf16 %v259_v0  ;;  %v332_v6 = vld [vmem:[%s455_s0 + $0x18] sm:$0xff]   ;;  %v264_v8 = vunpack.c.l.bf16 %v330_v4  ;;  %v265_v9 = vunpack.c.h.bf16 %v330_v4  ;;  %v334_v35 = vld [vmem:[%s455_s0 + $0x28] sm:$0xff]  }
   0x3   :  { %v384_v7 = vld [vmem:[%s457_s2] ss:$0 sm:$0xff]  ;;  %v268_v10 = vunpack.c.l.bf16 %v331_v5  ;;  %v269_v11 = vunpack.c.h.bf16 %v331_v5  ;;  %v272_v14 = vunpack.c.l.bf16 %v332_v6  ;;  %v273_v15 = vunpack.c.h.bf16 %v332_v6 }
   0x4   :  { %v53_v12 = vmul.f32 %v260_v2, %v370_v1  ;;  %v54_v13 = vmul.f32 %v261_v3, %v370_v1  ;;  %v55_v16 = vmul.f32 %v264_v8, %v370_v1  ;;  %v56_v17 = vmul.f32 %v265_v9, %v370_v1  ;;  %v333_v34 = vld [vmem:[%s455_s0 + $0x20] sm:$0xff]  }
   0x5   :  { %v57_v18 = vmul.f32 %v268_v10, %v370_v1  ;;  %v58_v19 = vmul.f32 %v269_v11, %v370_v1  ;;  %v59_v22 = vmul.f32 %v272_v14, %v370_v1  ;;  %v60_v23 = vmul.f32 %v273_v15, %v370_v1 }
   0x6   :  { %v76_v20 = vadd.f32 %v384_v7, %v53_v12  ;;  %v77_v21 = vadd.f32 %v384_v7, %v54_v13  ;;  %v78_v24 = vadd.f32 %v384_v7, %v55_v16  ;;  %v79_v25 = vadd.f32 %v384_v7, %v56_v17 }
   0x7   :  { %v80_v26 = vadd.f32 %v384_v7, %v57_v18  ;;  %v81_v27 = vadd.f32 %v384_v7, %v58_v19  ;;  %v82_v42 = vadd.f32 %v384_v7, %v59_v22  ;;  %v83_v43 = vadd.f32 %v384_v7, %v60_v23 }
   0x8   :  { %vm92_vm0 = vcmp.gt.f32.partialorder %v76_v20, 0.0  ;;  %vm93_vm1 = vcmp.gt.f32.partialorder %v77_v21, 0.0  ;;  %v108_v28 = vmul.f32 0.0, %v76_v20  ;;  %v109_v29 = vmul.f32 0.0, %v77_v21 }
   0x9   :  { %vm94_vm2 = vcmp.gt.f32.partialorder %v78_v24, 0.0  ;;  %vm95_vm3 = vcmp.gt.f32.partialorder %v79_v25, 0.0  ;;  %v110_v30 = vmul.f32 0.0, %v78_v24  ;;  %v111_v31 = vmul.f32 0.0, %v79_v25 }
   0xa   :  { %v124_v32 = vsel %vm92_vm0, %v76_v20, %v108_v28  ;;  %v125_v33 = vsel %vm93_vm1, %v77_v21, %v109_v29  ;;  %vm96_vm4 = vcmp.gt.f32.partialorder %v80_v26, 0.0  ;;  %vm97_vm5 = vcmp.gt.f32.partialorder %v81_v27, 0.0 }
   0xb   :  { %v293_v36 = vpack.c.bf16 %v125_v33, %v124_v32  ;;  %v126_v37 = vsel %vm94_vm2, %v78_v24, %v110_v30  ;;  %v127_v38 = vsel %vm95_vm3, %v79_v25, %v111_v31  ;;  %v112_v39 = vmul.f32 0.0, %v80_v26 }
   0xc   :  { %v298_v40 = vpack.c.bf16 %v127_v38, %v126_v37  ;;  %v113_v41 = vmul.f32 0.0, %v81_v27  ;;  %v276_v45 = vunpack.c.l.bf16 %v333_v34  ;;  %v277_v46 = vunpack.c.h.bf16 %v333_v34 }
   0xd   :  { %294 = vst [vmem:[%s458_s3] sm:$0xff] %v293_v36   ;;  %v128_v44 = vsel %vm96_vm4, %v80_v26, %v112_v39  ;;  %v280_v47 = vunpack.c.l.bf16 %v334_v35  ;;  %vm98_vm6 = vcmp.gt.f32.partialorder %v82_v42, 0.0  ;;  %vm99_vm7 = vcmp.gt.f32.partialorder %v83_v43, 0.0 }
   0xe   :  { %v129_v49 = vsel %vm97_vm5, %v81_v27, %v113_v41  ;;  %v114_v50 = vmul.f32 0.0, %v82_v42  ;;  %v115_v52 = vmul.f32 0.0, %v83_v43  ;;  %v61_v53 = vmul.f32 %v276_v45, %v370_v1 }
   0xf   :  { %v303_v51 = vpack.c.bf16 %v129_v49, %v128_v44  ;;  %v62_v54 = vmul.f32 %v277_v46, %v370_v1  ;;  %v281_v56 = vunpack.c.h.bf16 %v334_v35  ;;  %v63_v57 = vmul.f32 %v280_v47, %v370_v1 }
  0x10   :  { %v130_v55 = vsel %vm98_vm6, %v82_v42, %v114_v50  ;;  %v131_v59 = vsel %vm99_vm7, %v83_v43, %v115_v52  ;;  %v84_v60 = vadd.f32 %v384_v7, %v61_v53 }
  0x11   :  { %v85_v61 = vadd.f32 %v384_v7, %v62_v54  ;;  %v308_v63 = vpack.c.bf16 %v131_v59, %v130_v55  ;;  %v64_v0 = vmul.f32 %v281_v56, %v370_v1  ;;  %v86_v2 = vadd.f32 %v384_v7, %v63_v57 }
  0x12   :  { %vm100_vm8 = vcmp.gt.f32.partialorder %v84_v60, 0.0  ;;  %v116_v5 = vmul.f32 0.0, %v84_v60 }
  0x13   :  { %vm101_vm9 = vcmp.gt.f32.partialorder %v85_v61, 0.0  ;;  %v117_v6 = vmul.f32 0.0, %v85_v61  ;;  %v87_v8 = vadd.f32 %v384_v7, %v64_v0  ;;  %vm102_vm10 = vcmp.gt.f32.partialorder %v86_v2, 0.0 }
  0x14   :  { %v335_v48 = vld [vmem:[%s455_s0 + $0x30] sm:$0xff]   ;;  %v118_v9 = vmul.f32 0.0, %v86_v2  ;;  %v132_v11 = vsel %vm100_vm8, %v84_v60, %v116_v5 }
  0x15   :  { %337 = vst [vmem:[%s458_s3 + $0x8] sm:$0xff] %v298_v40   ;;  %v284_v58 = vunpack.c.l.bf16 %v335_v48  ;;  %338 = vst [vmem:[%s458_s3 + $0x10] sm:$0xff] %v303_v51   ;;  %v285_v62 = vunpack.c.h.bf16 %v335_v48  ;;  %v133_v12 = vsel %vm101_vm9, %v85_v61, %v117_v6  ;;  %vm103_vm11 = vcmp.gt.f32.partialorder %v87_v8, 0.0 }
  0x16   :  { %v313_v15 = vpack.c.bf16 %v133_v12, %v132_v11  ;;  %v119_v16 = vmul.f32 0.0, %v87_v8  ;;  %v134_v17 = vsel %vm102_vm10, %v86_v2, %v118_v9 }
  0x17   :  { %v65_v3 = vmul.f32 %v284_v58, %v370_v1  ;;  %v66_v10 = vmul.f32 %v285_v62, %v370_v1 }
  0x18   :  { %v135_v21 = vsel %vm103_vm11, %v87_v8, %v119_v16 }
  0x19   :  { %v88_v13 = vadd.f32 %v384_v7, %v65_v3  ;;  %v89_v18 = vadd.f32 %v384_v7, %v66_v10  ;;  %v318_v23 = vpack.c.bf16 %v135_v21, %v134_v17 }
  0x1b   :  { %vm104_vm12 = vcmp.gt.f32.partialorder %v88_v13, 0.0  ;;  %v120_v19 = vmul.f32 0.0, %v88_v13  ;;  %vm105_vm13 = vcmp.gt.f32.partialorder %v89_v18, 0.0  ;;  %v121_v24 = vmul.f32 0.0, %v89_v18 }
  0x1c   :  { %v336_v4 = vld [vmem:[%s455_s0 + $0x38] sm:$0xff]  }
  0x1d   :  { %339 = vst [vmem:[%s458_s3 + $0x18] sm:$0xff] %v308_v63   ;;  %v288_v14 = vunpack.c.l.bf16 %v336_v4  ;;  %v289_v20 = vunpack.c.h.bf16 %v336_v4  ;;  %340 = vst [vmem:[%s458_s3 + $0x20] sm:$0xff] %v313_v15   ;;  %v136_v25 = vsel %vm104_vm12, %v88_v13, %v120_v19  ;;  %v137_v28 = vsel %vm105_vm13, %v89_v18, %v121_v24 }
  0x1e   :  { %341 = vst [vmem:[%s458_s3 + $0x28] sm:$0xff] %v318_v23   ;;  %v323_v29 = vpack.c.bf16 %v137_v28, %v136_v25 }
  0x1f   :  { %v67_v22 = vmul.f32 %v288_v14, %v370_v1  ;;  %v68_v26 = vmul.f32 %v289_v20, %v370_v1 }
  0x20   :  { %342 = vst [vmem:[%s458_s3 + $0x30] sm:$0xff] %v323_v29  }
  0x21   :  { %v90_v27 = vadd.f32 %v384_v7, %v67_v22  ;;  %v91_v30 = vadd.f32 %v384_v7, %v68_v26 }
  0x23   :  { %vm106_vm14 = vcmp.gt.f32.partialorder %v90_v27, 0.0  ;;  %v122_v31 = vmul.f32 0.0, %v90_v27  ;;  %vm107_vm15 = vcmp.gt.f32.partialorder %v91_v30, 0.0  ;;  %v123_v32 = vmul.f32 0.0, %v91_v30 }
  0x25   :  { %v138_v33 = vsel %vm106_vm14, %v90_v27, %v122_v31  ;;  %v139_v1 = vsel %vm107_vm15, %v91_v30, %v123_v32 }
  0x26   :  { %v328_v34 = vpack.c.bf16 %v139_v1, %v138_v33 }
  0x28   :  { %343 = vst [vmem:[%s458_s3 + $0x38] sm:$0xff] %v328_v34  }

// kernel: block_forward.2
= control target key start
LH: loop header
LB: loop body
LE: loop exit
PB: predicated region body
PF: predicated region fallthrough
CT: control target
= control target key end

     0   :  { %vm377_vm0 = vcmask 1040384   ;;  %vm379_vm1 = vcmask 1041408   ;;  %s660_s1 = inlined_call_operand.vmem [shape: bf16[128,128], index: 1, kind: input, shape index: {}]   ;;  %s661_s0 = inlined_call_operand.vmem [shape: bf16[128,128], index: 0, kind: input, shape index: {}]   ;;  %s662_s2 = inlined_call_operand.vmem [shape: bf16[128,128], index: 2, kind: output, shape index: {0}]   ;;  %s663_s3 = inlined_call_operand.vmem [shape: f32[8,128], index: 3, kind: output, shape index: {1}]  }
   0x1   :  { %v549_v0 = vld [vmem:[%s660_s1 + $0x38] sm:$0xff]   ;;  %v550_v1 = vld [vmem:[%s660_s1 + $0x30] sm:$0xff]   ;;  %v551_v2 = vld [vmem:[%s660_s1 + $0x28] sm:$0xff]  }
   0x2   :  { %501 = vmatprep.subr.bf16.mxu0 %v549_v0  ;;  %533 = vmatprep.subr.bf16.mxu1 %v549_v0  ;;  %v552_v3 = vld [vmem:[%s660_s1 + $0x20] sm:$0xff]   ;;  %v553_v5 = vld [vmem:[%s660_s1 + $0x18] sm:$0xff]   ;;  %v554_v7 = vld [vmem:[%s660_s1 + $0x10] sm:$0xff]  }
   0x3   :  { %502 = vmatpush3.bf16.msra.mxu0 %v549_v0  ;;  %541 = vmatpush3.bf16.msra.mxu1 %v549_v0  ;;  %v557_v4 = vld [vmem:[%s661_s0] sm:$0xff]   ;;  %v555_v8 = vld [vmem:[%s660_s1 + $0x8] sm:$0xff]   ;;  %v559_v12 = vld [vmem:[%s661_s0 + $0x10] sm:$0xff]  }
   0x4   :  { %503 = vmatprep.subr.bf16.mxu0 %v550_v1  ;;  %534 = vmatprep.subr.bf16.mxu1 %v550_v1  ;;  %v561_v6 = vld [vmem:[%s661_s0 + $0x20] sm:$0xff]   ;;  %v558_v10 = vld [vmem:[%s661_s0 + $0x8] sm:$0xff]   ;;  %v563_v13 = vld [vmem:[%s661_s0 + $0x30] sm:$0xff]  }
   0x5   :  { %517 = vmatprep.mubr.bf16.mxu0 %v557_v4  ;;  %525 = vmatprep.mubr.bf16.mxu1 %v561_v6  ;;  %v556_v9 = vld [vmem:[%s660_s1] sm:$0xff]   ;;  %v562_v11 = vld [vmem:[%s661_s0 + $0x28] sm:$0xff]   ;;  %v560_v14 = vld [vmem:[%s661_s0 + $0x18] sm:$0xff]  }
   0x6   :  { %v564_v15 = vld [vmem:[%s661_s0 + $0x38] sm:$0xff]  }
   0x7   :  { %504 = vmatpush3.bf16.msra.mxu0 %v550_v1  ;;  %542 = vmatpush3.bf16.msra.mxu1 %v550_v1 }
   0x8   :  { %505 = vmatprep.subr.bf16.mxu0 %v551_v2  ;;  %535 = vmatprep.subr.bf16.mxu1 %v551_v2 }
   0xb   :  { %506 = vmatpush3.bf16.msra.mxu0 %v551_v2  ;;  %543 = vmatpush3.bf16.msra.mxu1 %v551_v2 }
   0xc   :  { %507 = vmatprep.subr.bf16.mxu0 %v552_v3  ;;  %536 = vmatprep.subr.bf16.mxu1 %v552_v3 }
   0xf   :  { %508 = vmatpush3.bf16.msra.mxu0 %v552_v3  ;;  %544 = vmatpush3.bf16.msra.mxu1 %v552_v3 }
  0x10   :  { %509 = vmatprep.subr.bf16.mxu0 %v553_v5  ;;  %537 = vmatprep.subr.bf16.mxu1 %v553_v5 }
  0x13   :  { %510 = vmatpush3.bf16.msra.mxu0 %v553_v5  ;;  %545 = vmatpush3.bf16.msra.mxu1 %v553_v5 }
  0x14   :  { %511 = vmatprep.subr.bf16.mxu0 %v554_v7  ;;  %538 = vmatprep.subr.bf16.mxu1 %v554_v7 }
  0x17   :  { %512 = vmatpush3.bf16.msra.mxu0 %v554_v7  ;;  %546 = vmatpush3.bf16.msra.mxu1 %v554_v7 }
  0x18   :  { %513 = vmatprep.subr.bf16.mxu0 %v555_v8  ;;  %539 = vmatprep.subr.bf16.mxu1 %v555_v8 }
  0x1b   :  { %514 = vmatpush3.bf16.msra.mxu0 %v555_v8  ;;  %547 = vmatpush3.bf16.msra.mxu1 %v555_v8 }
  0x1c   :  { %515 = vmatprep.subr.bf16.mxu0 %v556_v9  ;;  %540 = vmatprep.subr.bf16.mxu1 %v556_v9 }
  0x1f   :  { %516 = vmatpush3.bf16.msra.mxu0 %v556_v9  ;;  %548 = vmatpush3.bf16.msra.mxu1 %v556_v9 }
  0x22   :  { %518 = vmatmul.mubr.bf16.vlgmr.msra.gmra.mxu0 %v558_v10  ;;  %526 = vmatmul.mubr.bf16.vlgmr.msra.gmra.mxu1 %v562_v11 }
  0x23   :  { %521 = vmatprep.mubr.bf16.mxu0 %v559_v12  ;;  %529 = vmatprep.mubr.bf16.mxu1 %v563_v13 }
  0x2a   :  { %522 = vmatmul.mubr.bf16.gmra.mxu0 %v560_v14  ;;  %530 = vmatmul.mubr.bf16.gmra.mxu1 %v564_v15 }
  0xe2   :  { %v519_v16 = vpop.f32.mrf.mxu0  ;;  %v527_v17 = vpop.f32.mrf.mxu1 }
  0xe3   :  { %v342_v33 = vmul.f32 %v519_v16, %v519_v16  ;;  %v350_v3 = vmul.f32 %v527_v17, %v527_v17 }
  0xe4   :  { %v176_v18 = vpop.f32.mrf.mxu0  ;;  %v208_v19 = vpop.f32.mrf.mxu1 }
  0xe5   :  { %v340_v24 = vmul.f32 %v176_v18, %v176_v18  ;;  %v348_v61 = vmul.f32 %v208_v19, %v208_v19 }
  0xe6   :  { %v520_v20 = vpop.f32.mrf.mxu0  ;;  %v528_v21 = vpop.f32.mrf.mxu1 }
  0xe7   :  { %v446_v22 = vpack.c.bf16 %v520_v20, %v519_v16  ;;  %v466_v23 = vpack.c.bf16 %v528_v21, %v527_v17  ;;  %v343_v38 = vmul.f32 %v520_v20, %v520_v20  ;;  %v351_v6 = vmul.f32 %v528_v21, %v528_v21 }
  0xe8   :  { %v179_v25 = vpop.f32.mrf.mxu0  ;;  %v211_v26 = vpop.f32.mrf.mxu1 }
  0xe9   :  { %478 = vst [vmem:[%s662_s2 + $0x8] sm:$0xff] %v446_v22   ;;  %v441_v27 = vpack.c.bf16 %v179_v25, %v176_v18  ;;  %v319_v28 = vadd.f32 %v179_v25, %v176_v18  ;;  %v341_v29 = vmul.f32 %v179_v25, %v179_v25  ;;  %482 = vst [vmem:[%s662_s2 + $0x28] sm:$0xff] %v466_v23  }
  0xea   :  { %v461_v30 = vpack.c.bf16 %v211_v26, %v208_v19  ;;  %v523_v31 = vpop.f32.mrf.mxu0  ;;  %v531_v32 = vpop.f32.mrf.mxu1  ;;  %v349_v1 = vmul.f32 %v211_v26, %v211_v26 }
  0xeb   :  { %442 = vst [vmem:[%s662_s2] sm:$0xff] %v441_v27   ;;  %v320_v34 = vadd.f32 %v519_v16, %v319_v28  ;;  %v356_v35 = vadd.f32 %v341_v29, %v340_v24  ;;  %v346_v55 = vmul.f32 %v523_v31, %v523_v31  ;;  %v354_v15 = vmul.f32 %v531_v32, %v531_v32 }
  0xec   :  { %481 = vst [vmem:[%s662_s2 + $0x20] sm:$0xff] %v461_v30   ;;  %v192_v36 = vpop.f32.mrf.mxu0  ;;  %v224_v37 = vpop.f32.mrf.mxu1 }
  0xed   :  { %v357_v39 = vadd.f32 %v356_v35, %v342_v33  ;;  %v321_v40 = vadd.f32 %v520_v20, %v320_v34  ;;  %v344_v44 = vmul.f32 %v192_v36, %v192_v36  ;;  %v352_v10 = vmul.f32 %v224_v37, %v224_v37 }
  0xee   :  { %v524_v41 = vpop.f32.mrf.mxu0  ;;  %v532_v42 = vpop.f32.mrf.mxu1 }
  0xef   :  { %v322_v43 = vadd.f32 %v321_v40, %v192_v36  ;;  %v358_v45 = vadd.f32 %v357_v39, %v343_v38  ;;  %v456_v46 = vpack.c.bf16 %v524_v41, %v523_v31  ;;  %v476_v48 = vpack.c.bf16 %v532_v42, %v531_v32 }
  0xf0   :  { %v195_v47 = vpop.f32.mrf.mxu0  ;;  %v227_v49 = vpop.f32.mrf.mxu1  ;;  %v347_v58 = vmul.f32 %v524_v41, %v524_v41  ;;  %v355_v20 = vmul.f32 %v532_v42, %v532_v42 }
  0xf1   :  { %v359_v50 = vadd.f32 %v358_v45, %v344_v44  ;;  %480 = vst [vmem:[%s662_s2 + $0x18] sm:$0xff] %v456_v46   ;;  %v451_v51 = vpack.c.bf16 %v195_v47, %v192_v36  ;;  %v323_v52 = vadd.f32 %v322_v43, %v195_v47  ;;  %v345_v53 = vmul.f32 %v195_v47, %v195_v47 }
  0xf2   :  { %484 = vst [vmem:[%s662_s2 + $0x38] sm:$0xff] %v476_v48   ;;  %v471_v54 = vpack.c.bf16 %v227_v49, %v224_v37  ;;  %v353_v14 = vmul.f32 %v227_v49, %v227_v49 }
  0xf3   :  { %479 = vst [vmem:[%s662_s2 + $0x10] sm:$0xff] %v451_v51   ;;  %v324_v56 = vadd.f32 %v523_v31, %v323_v52  ;;  %v360_v57 = vadd.f32 %v359_v50, %v345_v53 }
  0xf4   :  { %483 = vst [vmem:[%s662_s2 + $0x30] sm:$0xff] %v471_v54  }
  0xf5   :  { %v325_v59 = vadd.f32 %v524_v41, %v324_v56  ;;  %v361_v60 = vadd.f32 %v360_v57, %v346_v55 }
  0xf7   :  { %v362_v62 = vadd.f32 %v361_v60, %v347_v58  ;;  %v326_v63 = vadd.f32 %v325_v59, %v208_v19 }
  0xf9   :  { %v327_v0 = vadd.f32 %v326_v63, %v211_v26  ;;  %v363_v2 = vadd.f32 %v362_v62, %v348_v61 }
  0xfb   :  { %v328_v4 = vadd.f32 %v527_v17, %v327_v0  ;;  %v364_v5 = vadd.f32 %v363_v2, %v349_v1 }
  0xfd   :  { %v365_v7 = vadd.f32 %v364_v5, %v350_v3  ;;  %v329_v8 = vadd.f32 %v528_v21, %v328_v4 }
  0xff   :  { %v330_v9 = vadd.f32 %v329_v8, %v224_v37  ;;  %v366_v11 = vadd.f32 %v365_v7, %v351_v6 }
 0x101   :  { %v367_v12 = vadd.f32 %v366_v11, %v352_v10  ;;  %v331_v13 = vadd.f32 %v330_v9, %v227_v49 }
 0x103   :  { %v332_v16 = vadd.f32 %v531_v32, %v331_v13  ;;  %v368_v18 = vadd.f32 %v367_v12, %v353_v14 }
 0x105   :  { %v333_v19 = vadd.f32 %v532_v42, %v332_v16  ;;  %v369_v22 = vadd.f32 %v368_v18, %v354_v15 }
 0x107   :  { %v334_v23 = vrot.slane %v333_v19, 4  ;;  %v370_v24 = vadd.f32 %v369_v22, %v355_v20 }
 0x109   :  { %v335_v25 = vadd.f32 %v334_v23, %v333_v19  ;;  %v371_v17 = vrot.slane %v370_v24, 4 }
 0x10b   :  { %v336_v26 = vrot.slane %v335_v25, 2  ;;  %v372_v27 = vadd.f32 %v371_v17, %v370_v24 }
 0x10d   :  { %v337_v28 = vadd.f32 %v336_v26, %v335_v25  ;;  %v373_v21 = vrot.slane %v372_v27, 2 }
 0x10f   :  { %v338_v29 = vrot.slane %v337_v28, 1  ;;  %v374_v30 = vadd.f32 %v373_v21, %v372_v27 }
 0x111   :  { %v375_v31 = vrot.slane %v374_v30, 1  ;;  %v339_v33 = vadd.f32 %v338_v29, %v337_v28 }
 0x113   :  { %v376_v34 = vadd.f32 %v375_v31, %v374_v30 }
 0x115   :  { %v378_v32 = vsel %vm377_vm0, %v339_v33, %v376_v34 }
 0x116   :  { %v380_v35 = vsel %vm379_vm1, %v378_v32, 0.0 }
 0x117   :  { %381 = vst [vmem:[%s663_s3] sm:$0xff] %v380_v35 }

</bundles_post_ra>
